<compile_context>
chip_gen: v6e
topology: v6e:2x2x1
jax: 0.10.0
libtpu: 0.0.40
codegen_flags: <defaults>
</compile_context>

<pallas_src>
import functools
import math

import jax
import jax.numpy as jnp
from jax.experimental import pallas as pl
from jax.experimental.pallas import tpu as pltpu


# ---------------------------------------------------------------------------
# Kernels
# ---------------------------------------------------------------------------
def _row_sum_kernel(x_ref, w_ref, sum_ref, acc_ref, *, pad_cols):
    """Pass 1: accumulate sum_j exp(s*cosa*10) over class tiles."""
    cj = pl.program_id(1)

    @pl.when(cj == 0)
    def _():
        acc_ref[...] = jnp.zeros_like(acc_ref)

    # Inputs are pre-normalized; w is pre-scaled by s, so sdot = s * cosa * 10.
    sdot = jnp.dot(x_ref[...], w_ref[...], preferred_element_type=jnp.float32)
    acc_ref[...] += jnp.sum(jnp.exp(sdot), axis=1, keepdims=True)

    @pl.when(cj == pl.num_programs(1) - 1)
    def _():
        # Padded weight columns are exactly zero -> exp(0)=1 each; subtract
        # the compile-time count instead of masking with iota/where.
        sum_ref[...] = acc_ref[...] - pad_cols


def _arc_out_kernel(x_ref, w_ref, sum_ref, o_ref, *, s, m):
    """Pass 2: emit log(top / (top + S - e)) for one (batch, class) tile."""
    sdot = jnp.dot(x_ref[...], w_ref[...], preferred_element_type=jnp.float32)

    # Trig identity (cosa = sdot / (10 s)):
    #   s * cos(arccos(cosa) + m) * 10
    #     = cos(m) * sdot - 10*s*sin(m) * sqrt(1 - 0.01 * (sdot/s)^2)
    cm = math.cos(m)                      # constants folded at trace time
    c2 = 10.0 * s * math.sin(m)
    k = 0.01 / (s * s)
    root = jnp.sqrt(jnp.maximum(1.0 - k * (sdot * sdot), 0.0))
    log_top = cm * sdot - c2 * root       # = s * cos(a + m) * 10

    e = jnp.exp(sdot)                     # exp(s * cosa * 10)
    down = jnp.exp(log_top) + (sum_ref[...] - e)
    o_ref[...] = (log_top - jnp.log(down)).astype(o_ref.dtype)


# ---------------------------------------------------------------------------
# Wrapper
# ---------------------------------------------------------------------------
def _round_up(v, mult):
    return ((v + mult - 1) // mult) * mult


def _largest_divisor_tile(total, base, cap):
    """Largest multiple of `base` that divides `total` and is <= cap."""
    cap = max(base, min(int(cap), total))
    cap = (cap // base) * base
    for t in range(cap, base - 1, -base):
        if total % t == 0:
            return t
    return base


def arc_softmax(x, w, s=10.0, m=0.01, *, use_bf16_matmul=False):
    """Pallas implementation of ArcSoftmax.forward(x, s, m)."""
    n, d = x.shape
    d2, c = w.shape
    assert d == d2
    s = float(s)
    m = float(m)

    # --- Normalize + scale ONCE in the wrapper (not per grid step). ---------
    # F.normalize with eps=1e-12:  v / max(||v||, 1e-12) == v * rsqrt(max(ss,1e-24))
    eps2 = 1e-24
    xf = x.astype(jnp.float32)
    wf = w.astype(jnp.float32)
    x_n = xf * jax.lax.rsqrt(jnp.maximum(jnp.sum(xf * xf, axis=1, keepdims=True), eps2))
    # Fold the "* s * 10 / 10" scale into w so the matmul yields s*cosa*10.
    w_s = s * wf * jax.lax.rsqrt(jnp.maximum(jnp.sum(wf * wf, axis=0, keepdims=True), eps2))

    op_dtype = jnp.bfloat16 if use_bf16_matmul else jnp.float32
    bpe = jnp.dtype(op_dtype).itemsize

    # --- Tile selection. -----------------------------------------------------
    n_pad = _round_up(n, 8)
    tile_n = _largest_divisor_tile(n_pad, 8, 256)   # no near-empty 256-row tiles
    d_pad = _round_up(d, 128)
    c_pad = _round_up(c, 128)

    # Per-generation VMEM budget (v5e/v6e: 128 MiB, v7x: 64 MiB physical).
    try:
        vmem_cap = int(pltpu.get_tpu_info().vmem_capacity_bytes)
    except Exception:  # interpret mode / older runtimes
        vmem_cap = 64 * 1024 * 1024
    budget = min(vmem_cap // 2, 48 * 1024 * 1024)

    # Live bytes per step ~= x(2buf) + w(2buf) + out(2buf, f32) + ~5 f32
    # (tile_n, tile_c) intermediates.  Solve for tile_c.
    x_bytes = 2 * tile_n * d_pad * bpe
    denom = 2 * d_pad * bpe + (2 * 4 + 5 * 4) * tile_n
    max_tile_c = max(128, (budget - x_bytes) // denom)
    tile_c = _largest_divisor_tile(c_pad, 128, max_tile_c)

    est_bytes = (x_bytes + 2 * d_pad * tile_c * bpe
                 + (2 * 4 + 5 * 4) * tile_n * tile_c + (1 << 20))
    vmem_limit = int(min(vmem_cap * 3 // 4, max(2 * est_bytes, 32 * 1024 * 1024)))

    # --- Pad to lane/sublane-dense shapes (skip copies when aligned). -------
    if (n_pad, d_pad) == (n, d) and x_n.dtype == op_dtype:
        x_p = x_n
    else:
        x_p = jnp.zeros((n_pad, d_pad), op_dtype).at[:n, :d].set(x_n.astype(op_dtype))
    if (d_pad, c_pad) == (d, c) and w_s.dtype == op_dtype:
        w_p = w_s
    else:
        w_p = jnp.zeros((d_pad, c_pad), op_dtype).at[:d, :c].set(w_s.astype(op_dtype))

    grid = (n_pad // tile_n, c_pad // tile_c)

    # --- Pass 1: per-row sum of exp(s*cosa*10) over all (real) classes. -----
    sums = pl.pallas_call(
        functools.partial(_row_sum_kernel, pad_cols=float(c_pad - c)),
        out_shape=jax.ShapeDtypeStruct((n_pad, 1), jnp.float32),
        grid=grid,
        in_specs=[
            pl.BlockSpec((tile_n, d_pad), lambda i, j: (i, 0)),
            pl.BlockSpec((d_pad, tile_c), lambda i, j: (0, j)),
        ],
        out_specs=pl.BlockSpec((tile_n, 1), lambda i, j: (i, 0)),
        scratch_shapes=[pltpu.VMEM((tile_n, 1), jnp.float32)],
        compiler_params=pltpu.CompilerParams(
            dimension_semantics=("parallel", "arbitrary"),
            vmem_limit_bytes=vmem_limit),
    )(x_p, w_p)

    # --- Pass 2: emit the output; fully parallel grid (both TCs on v7x). ----
    out = pl.pallas_call(
        functools.partial(_arc_out_kernel, s=s, m=m),
        out_shape=jax.ShapeDtypeStruct((n_pad, c_pad), jnp.float32),
        grid=grid,
        in_specs=[
            pl.BlockSpec((tile_n, d_pad), lambda i, j: (i, 0)),
            pl.BlockSpec((d_pad, tile_c), lambda i, j: (0, j)),
            pl.BlockSpec((tile_n, 1), lambda i, j: (i, 0)),
        ],
        out_specs=pl.BlockSpec((tile_n, tile_c), lambda i, j: (i, j)),
        compiler_params=pltpu.CompilerParams(
            dimension_semantics=("parallel", "parallel"),
            vmem_limit_bytes=vmem_limit),
    )(x_p, w_p, sums)

    return out[:n, :c]


# ---------------------------------------------------------------------------
# Pure-JAX reference mirroring the PyTorch module
# ---------------------------------------------------------------------------
def arc_softmax_ref(x, w, s=10.0, m=0.01):
    x_norm = x / jnp.maximum(jnp.linalg.norm(x, axis=1, keepdims=True), 1e-12)
    w_norm = w / jnp.maximum(jnp.linalg.norm(w, axis=0, keepdims=True), 1e-12)
    cosa = (x_norm @ w_norm) / 10.0
    a = jnp.arccos(cosa)
    top = jnp.exp(s * jnp.cos(a + m) * 10.0)
    e = jnp.exp(s * cosa * 10.0)
    down = top + jnp.sum(e, axis=1, keepdims=True) - e
    return jnp.log(top / down)


if __name__ == "__main__":
    feature_dim = 2
    cls_num = 10
    batch = 8

    key = jax.random.PRNGKey(0)
    kx, kw = jax.random.split(key)
    w = jax.random.normal(kw, (feature_dim, cls_num), dtype=jnp.float32)
    x = jax.random.normal(kx, (batch, feature_dim), dtype=jnp.float32)

    out = arc_softmax(x, w, s=10.0, m=0.01)
    out = jax.block_until_ready(out)

    ref = arc_softmax_ref(x, w, s=10.0, m=0.01)
    assert out.shape == (batch, cls_num)
    assert jnp.allclose(out, ref, atol=1e-4, rtol=1e-4), "mismatch vs reference"

    print("KERNEL_OK")
</pallas_src>

<mosaic_0001>
module attributes {stable_mosaic.version = 11 : i64} {
  func.func @_row_sum_kernel(%arg0: i32, %arg1: i32, %arg2: memref<8x128xf32, #tpu.memory_space<vmem>>, %arg3: memref<128x128xf32, #tpu.memory_space<vmem>>, %arg4: memref<8x1xf32, #tpu.memory_space<vmem>>, %arg5: memref<8x1xf32, #tpu.memory_space<vmem>>) attributes {dimension_semantics = [#tpu.dimension_semantics<parallel>, #tpu.dimension_semantics<arbitrary>], iteration_bounds = array<i64: 1, 1>, scalar_prefetch = 0 : i64, scratch_operands = 1 : i64, tpu.core_type = #tpu.core_type<tc>, window_params = [{transform_indices = @transform_0, window_bounds = array<i64: 8, 128>}, {transform_indices = @transform_1, window_bounds = array<i64: 128, 128>}, {transform_indices = @transform_2, window_bounds = array<i64: 8, 1>}]} {
    %c0_i32 = arith.constant 0 : i32
    %0 = arith.cmpi eq, %arg1, %c0_i32 : i32
    %1 = arith.extui %0 : i1 to i32
    %c0_i32_0 = arith.constant 0 : i32
    %2 = arith.cmpi ne, %1, %c0_i32_0 : i32
    scf.if %2 {
      %cst_11 = arith.constant 0.000000e+00 : f32
      %15 = vector.broadcast %cst_11 : f32 to vector<8x1xf32>
      %c0_12 = arith.constant 0 : index
      %c0_13 = arith.constant 0 : index
      %16 = vector.load %arg5[%c0_12, %c0_13] : memref<8x1xf32, #tpu.memory_space<vmem>>, vector<8x1xf32>
      tpu.vector_store %arg5[%c0_12, %c0_13], %15 {strides = array<i32>} : memref<8x1xf32, #tpu.memory_space<vmem>>, vector<8x1xf32>,
    } else {
    }
    %c0 = arith.constant 0 : index
    %c0_1 = arith.constant 0 : index
    %3 = vector.load %arg2[%c0, %c0_1] : memref<8x128xf32, #tpu.memory_space<vmem>>, vector<8x128xf32>
    %c0_2 = arith.constant 0 : index
    %c0_3 = arith.constant 0 : index
    %4 = vector.load %arg3[%c0_2, %c0_3] : memref<128x128xf32, #tpu.memory_space<vmem>>, vector<128x128xf32>
    %cst = arith.constant dense<0.000000e+00> : vector<8x128xf32>
    %5 = tpu.matmul %3, %4, %cst {dimension_numbers = #tpu.dot_dimension_numbers<[1], [0], [0], [1], [0, 0, 1, 1], [], []>} : vector<8x128xf32>, vector<128x128xf32>, vector<8x128xf32> -> vector<8x128xf32>
    %c0_4 = arith.constant 0 : index
    %c0_5 = arith.constant 0 : index
    %6 = vector.load %arg5[%c0_4, %c0_5] : memref<8x1xf32, #tpu.memory_space<vmem>>, vector<8x1xf32>
    %7 = math.exp %5 : vector<8x128xf32>
    %cst_6 = arith.constant dense<0.000000e+00> : vector<8xf32>
    %8 = vector.multi_reduction <add>, %7, %cst_6 [1] : vector<8x128xf32> to vector<8xf32>
    %9 = vector.shape_cast %8 : vector<8xf32> to vector<8x1xf32>
    %10 = arith.addf %6, %9 : vector<8x1xf32>
    %c0_7 = arith.constant 0 : index
    %c0_8 = arith.constant 0 : index
    %11 = vector.load %arg5[%c0_7, %c0_8] : memref<8x1xf32, #tpu.memory_space<vmem>>, vector<8x1xf32>
    tpu.vector_store %arg5[%c0_7, %c0_8], %10 {strides = array<i32>} : memref<8x1xf32, #tpu.memory_space<vmem>>, vector<8x1xf32>,
    %c0_i32_9 = arith.constant 0 : i32
    %12 = arith.cmpi eq, %arg1, %c0_i32_9 : i32
    %13 = arith.extui %12 : i1 to i32
    %c0_i32_10 = arith.constant 0 : i32
    %14 = arith.cmpi ne, %13, %c0_i32_10 : i32
    scf.if %14 {
      %c0_11 = arith.constant 0 : index
      %c0_12 = arith.constant 0 : index
      %15 = vector.load %arg5[%c0_11, %c0_12] : memref<8x1xf32, #tpu.memory_space<vmem>>, vector<8x1xf32>
      %cst_13 = arith.constant 1.180000e+02 : f32
      %16 = vector.broadcast %cst_13 : f32 to vector<8x1xf32>
      %17 = arith.subf %15, %16 : vector<8x1xf32>
      %c0_14 = arith.constant 0 : index
      %c0_15 = arith.constant 0 : index
      %18 = vector.load %arg4[%c0_14, %c0_15] : memref<8x1xf32, #tpu.memory_space<vmem>>, vector<8x1xf32>
      tpu.vector_store %arg4[%c0_14, %c0_15], %17 {strides = array<i32>} : memref<8x1xf32, #tpu.memory_space<vmem>>, vector<8x1xf32>,
    } else {
    }
    return
  }
  func.func @transform_0(%arg0: i32, %arg1: i32) -> (i32, i32) {
    %c0_i32 = arith.constant 0 : i32
    %c0_i32_0 = arith.constant 0 : i32
    return %arg0, %c0_i32 : i32, i32
  }
  func.func @transform_1(%arg0: i32, %arg1: i32) -> (i32, i32) {
    %c0_i32 = arith.constant 0 : i32
    %c0_i32_0 = arith.constant 0 : i32
    return %c0_i32, %arg1 : i32, i32
  }
  func.func @transform_2(%arg0: i32, %arg1: i32) -> (i32, i32) {
    %c0_i32 = arith.constant 0 : i32
    %c0_i32_0 = arith.constant 0 : i32
    return %arg0, %c0_i32 : i32, i32
  }
}

</mosaic_0001>

<bundles_post_ra>
// kernel: tpu_custom_call.1
= control target key start
LH: loop header
LB: loop body
LE: loop exit
PB: predicated region body
PF: predicated region fallthrough
CT: control target
= control target key end

     0   :  { %7 = vsyncpa [#allocation4], 0  ;;  %s285_s0 = inlined_call_operand.hbm [shape: f32[8,128], index: 0, kind: input, shape index: {}]   ;;  %s286_s1 = inlined_call_operand.hbm [shape: f32[128,128], index: 1, kind: input, shape index: {}]   ;;  %s287_s2 = inlined_call_operand.vmem [shape: f32[8,1], index: 2, kind: output, shape index: {}]  }
   0x1   :  { %8 = vsyncpa [#allocation6], 0  ;;  %s255_s9 = smov [#allocation3]   ;;  %s256_s11 = smov [#allocation5]  }
   0x2   :  { %s15_s10 = sshll.u32 %s255_s9, 4  ;;  %s24_s12 = sshll.u32 %s256_s11, 4  ;;  %s16_s10 = int_to_ptr.vmem [resolvable:$true] %s15_s10  ;;  %s25_s12 = int_to_ptr.vmem [resolvable:$true] %s24_s12 }
   0x3   :  { %s219_s13 = scalar_lea.vmem %s16_s10, 128  ;;  %p224_p1 = scmp.lt.s32.totalorder %s16_s10, %s16_s10 }
   0x4   :  { %p220_p0 = scmp.ne.s32.totalorder %s16_s10, %s219_s13  ;;  %p225_p2 = scmp.lt.s32.totalorder %s219_s13, %s219_s13 }
   0x6   :  { %p226_p3 = por %p225_p2, %p224_p1 }
   0x8   :  { %p227_p4 = pnand %p226_p3, %p220_p0 }
   0xa   :  { %230 = shalt.err (!%p227_p4)
}
   0xb   :  { %18 = dma.hbm_to_vmem [thread:$0]  %s285_s0, 128, %s16_s10, [#allocation4]  }
   0xc   :  { %s239_s16 = scalar_lea.vmem %s25_s12, 2048  ;;  %p244_p6 = scmp.lt.s32.totalorder %s25_s12, %s25_s12 }
   0xd   :  { %p240_p5 = scmp.ne.s32.totalorder %s25_s12, %s239_s16  ;;  %p245_p7 = scmp.lt.s32.totalorder %s239_s16, %s239_s16 }
   0xf   :  { %p246_p8 = por %p245_p7, %p244_p6 }
  0x11   :  { %p247_p9 = pnand %p246_p8, %p240_p5 }
  0x13   :  { %250 = shalt.err (!%p247_p9)
}
  0x14   :  { %s257_s17 = smov 128   ;;  %s258_s18 = smov 8  }
  0x15   :  { %30 = dma.hbm_to_vmem [thread:$0]  %s286_s1, 2048, %s25_s12, [#allocation6], %s257_s17, %s257_s17, %s258_s18  }
  0x16   :  { %251 = dma.done.wait [#allocation4], 128  }
  0x17   :  { %252 = vsyncadd [#allocation4], 4294967168 }
  0x18   :  { %253 = dma.done.wait [#allocation6], 2048  }
  0x19   :  { %254 = vsyncadd [#allocation6], 4294965248  ;;  %v259_v0 = vmov 0.0   ;;  %vm260_vm0 = vmmov 0   ;;  %v59_v1 = vld [vmem:[#allocation5 + $0x78] sm:$0xff]  ;;  %v58_v2 = vld [vmem:[#allocation5 + $0x70] sm:$0xff] }
  0x1a   :  { %168 = vmatprep.subr.mxu0 %v259_v0  ;;  %200 = vmatprep.mubr.msk.f32.mxu0 %vm260_vm0, %v259_v0  ;;  %v57_v3 = vld [vmem:[#allocation5 + $0x68] sm:$0xff]  ;;  %v56_v4 = vld [vmem:[#allocation5 + $0x60] sm:$0xff]  ;;  %v55_v5 = vld [vmem:[#allocation5 + $0x58] sm:$0xff]  ;;  %vm41_vm1 = vcmask 7168  }
  0x1b   :  { %169 = vmatpush3.msra.mxu0 %v59_v1  ;;  %v54_v6 = vld [vmem:[#allocation5 + $0x50] sm:$0xff]  ;;  %v53_v7 = vld [vmem:[#allocation5 + $0x48] sm:$0xff]  ;;  %v52_v8 = vld [vmem:[#allocation5 + $0x40] sm:$0xff]  ;;  %42 = vst.msk [vmem:[#allocation2] sm:$0xff] %vm41_vm1, %v259_v0 }
  0x1c   :  { %170 = vmatprep.subr.mxu0 %v259_v0  ;;  %v51_v9 = vld [vmem:[#allocation5 + $0x38] sm:$0xff]  ;;  %v50_v10 = vld [vmem:[#allocation5 + $0x30] sm:$0xff]  ;;  %v49_v11 = vld [vmem:[#allocation5 + $0x28] sm:$0xff] }
  0x1d   :  { %171 = vmatpush3.msra.mxu0 %v58_v2  ;;  %v48_v12 = vld [vmem:[#allocation5 + $0x20] sm:$0xff]  ;;  %v47_v13 = vld [vmem:[#allocation5 + $0x18] sm:$0xff]  ;;  %v46_v14 = vld [vmem:[#allocation5 + $0x10] sm:$0xff] }
  0x1e   :  { %172 = vmatprep.subr.mxu0 %v259_v0  ;;  %v45_v15 = vld [vmem:[#allocation5 + $0x8] sm:$0xff]  ;;  %v44_v16 = vld [vmem:[#allocation5] sm:$0xff]  ;;  %v43_v17 = vld [vmem:[#allocation3] sm:$0xff] }
  0x1f   :  { %173 = vmatpush3.msra.mxu0 %v57_v3 }
  0x20   :  { %174 = vmatprep.subr.mxu0 %v259_v0 }
  0x21   :  { %175 = vmatpush3.msra.mxu0 %v56_v4 }
  0x22   :  { %176 = vmatprep.subr.mxu0 %v259_v0  ;;  %v130_v22 = vld [vmem:[#allocation2] sm:$0xff] }
  0x23   :  { %177 = vmatpush3.msra.mxu0 %v55_v5 }
  0x24   :  { %178 = vmatprep.subr.mxu0 %v259_v0 }
  0x25   :  { %179 = vmatpush3.msra.mxu0 %v54_v6 }
  0x26   :  { %180 = vmatprep.subr.mxu0 %v259_v0 }
  0x27   :  { %181 = vmatpush3.msra.mxu0 %v53_v7 }
  0x28   :  { %182 = vmatprep.subr.mxu0 %v259_v0 }
  0x29   :  { %183 = vmatpush3.msra.mxu0 %v52_v8 }
  0x2a   :  { %184 = vmatprep.subr.mxu0 %v259_v0 }
  0x2b   :  { %185 = vmatpush3.msra.mxu0 %v51_v9 }
  0x2c   :  { %186 = vmatprep.subr.mxu0 %v259_v0 }
  0x2d   :  { %187 = vmatpush3.msra.mxu0 %v50_v10 }
  0x2e   :  { %188 = vmatprep.subr.mxu0 %v259_v0 }
  0x2f   :  { %189 = vmatpush3.msra.mxu0 %v49_v11 }
  0x30   :  { %190 = vmatprep.subr.mxu0 %v259_v0 }
  0x31   :  { %191 = vmatpush3.msra.mxu0 %v48_v12 }
  0x32   :  { %192 = vmatprep.subr.mxu0 %v259_v0 }
  0x33   :  { %193 = vmatpush3.msra.mxu0 %v47_v13 }
  0x34   :  { %194 = vmatprep.subr.mxu0 %v259_v0 }
  0x35   :  { %195 = vmatpush3.msra.mxu0 %v46_v14 }
  0x36   :  { %196 = vmatprep.subr.mxu0 %v259_v0 }
  0x37   :  { %197 = vmatpush3.msra.mxu0 %v45_v15 }
  0x38   :  { %198 = vmatprep.subr.mxu0 %v259_v0 }
  0x39   :  { %199 = vmatpush3.msra.mxu0 %v44_v16 }
  0x3a   :  { %201 = vmatmul.mubr.f32.vlgmr.msra.gmra.mxu0 %v43_v17 }
  0xfa   :  { %v126_v18 = vpop.f32.mrf.mxu0 }
  0xfb   :  { %v131_v19 = vmul.f32 1.442695, %v126_v18 }
  0xfc   :  { %v202_v20 = vpop.f32.mrf.mxu0 }
  0xfd   :  { %209 = vpow2.f32 %v131_v19 }
 0x10a   :  { %v210_v21 = vpop.eup %209 }
 0x10b   :  { %133 = vadd.xlane.f32.xlu0 %v210_v21 }
 0x194   :  { %v134_v23 = vpop.xlane.xlu0 %133 }
 0x195   :  { %v135_v24 = vadd.f32 %v134_v23, %v130_v22 }
 0x197   :  { %137 = vst.msk [vmem:[#allocation2] sm:$0xff] %vm41_vm1, %v135_v24 }
 0x19e   :  { %v141_v25 = vld [vmem:[#allocation2] sm:$0xff] }
 0x19f   :  { %v150_v26 = vadd.f32 -118.0, %v141_v25 }
 0x1a1   :  { %143 = vst.msk [vmem:[%s287_s2] sm:$0xff] %vm41_vm1, %v150_v26 }
 0x1a2   :  { %148 = vsyncpa [#allocation4], 1 }
 0x1a3   :  { %149 = vsyncpa [#allocation6], 1 }

</bundles_post_ra>
